<compile_context>
chip_gen: v6e
topology: v6e:2x2x1
jax: 0.10.0
libtpu: 0.0.40
codegen_flags: <defaults>
</compile_context>

<pallas_src>
import functools

import jax
import jax.numpy as jnp
from jax import lax
from jax.experimental import pallas as pl
from jax.experimental.pallas import tpu as pltpu

LANE = 128
MAX_TILE_PIXELS = 8192  # lane-dense pixel tile (multiple of 128)


def _softmax_stats_kernel(pred_ref, tgt_ref, p_ref, nll_ref, *, ignore_label):
    """Per-pixel true-class softmax prob and cross-entropy NLL.

    pred_ref: (1, C, TN)  logits (native dtype, cast to f32 in VMEM)
    tgt_ref : (1, 1, TN)  int32 labels (ignore_label marks invalid / padded)
    p_ref   : (1, 1, TN)  f32  softmax prob of the true class (1.0 if invalid)
    nll_ref : (1, 1, TN)  f32  -log_softmax[true class]       (0.0 if invalid)
    """
    x = pred_ref[0].astype(jnp.float32)              # (C, TN)
    labels = tgt_ref[0]                              # (1, TN) int32
    valid = labels != ignore_label
    labels_safe = jnp.where(valid, labels, 0)

    # Numerically-stable log-sum-exp over the class (sublane) axis.
    m = jnp.max(x, axis=0, keepdims=True)            # (1, TN)
    e = jnp.exp(x - m)
    lse = m + jnp.log(jnp.sum(e, axis=0, keepdims=True))

    # Gather the true-class logit via one-hot compare + reduce (VPU work).
    c, tn = x.shape
    class_ids = lax.broadcasted_iota(jnp.int32, (c, tn), 0)
    x_true = jnp.sum(jnp.where(class_ids == labels_safe, x, 0.0),
                     axis=0, keepdims=True)          # (1, TN)

    nll = lse - x_true
    p_true = jnp.exp(x_true - lse)

    p_ref[0] = jnp.where(valid, p_true, jnp.float32(1.0))
    nll_ref[0] = jnp.where(valid, nll, jnp.float32(0.0))


def _per_pixel_stats(pred, target, ignore_label):
    """Run the Pallas kernel over (B, C, H, W) logits and (B, H, W) labels."""
    B, C, H, W = pred.shape
    HW = H * W

    # Large lane-dense tile along the pixel axis (multiple of 128).
    if HW >= MAX_TILE_PIXELS:
        tn = MAX_TILE_PIXELS
    else:
        tn = ((HW + LANE - 1) // LANE) * LANE
    hwp = ((HW + tn - 1) // tn) * tn

    pred3 = pred.reshape(B, C, HW)                       # free reshape, native dtype
    tgt3 = target.reshape(B, 1, HW).astype(jnp.int32)
    if hwp != HW:
        pad = hwp - HW
        pred3 = jnp.pad(pred3, ((0, 0), (0, 0), (0, pad)))
        tgt3 = jnp.pad(tgt3, ((0, 0), (0, 0), (0, pad)),
                       constant_values=ignore_label)

    grid = (B, hwp // tn)
    kernel = functools.partial(_softmax_stats_kernel, ignore_label=ignore_label)

    elem_bytes = pred.dtype.itemsize
    cost = pl.CostEstimate(
        flops=8 * B * C * hwp,
        transcendentals=B * (C + 2) * hwp,
        bytes_accessed=B * hwp * (C * elem_bytes + 4 + 2 * 4),
    )

    p, nll = pl.pallas_call(
        kernel,
        out_shape=(jax.ShapeDtypeStruct((B, 1, hwp), jnp.float32),
                   jax.ShapeDtypeStruct((B, 1, hwp), jnp.float32)),
        grid_spec=pltpu.PrefetchScalarGridSpec(
            num_scalar_prefetch=0,
            grid=grid,
            in_specs=[
                pl.BlockSpec((1, C, tn), lambda b, j: (b, 0, j)),
                pl.BlockSpec((1, 1, tn), lambda b, j: (b, 0, j)),
            ],
            out_specs=(
                pl.BlockSpec((1, 1, tn), lambda b, j: (b, 0, j)),
                pl.BlockSpec((1, 1, tn), lambda b, j: (b, 0, j)),
            ),
        ),
        compiler_params=pltpu.CompilerParams(
            dimension_semantics=("parallel", "parallel")),
        cost_estimate=cost,
    )(pred3, tgt3)

    valid = tgt3.reshape(-1) != ignore_label
    return p.reshape(-1), nll.reshape(-1), valid


def _base_forward(pred, target, *, ignore_label, thresh, min_kept):
    B, C, H, W = pred.shape
    n_pixels = B * H * W

    p_true, nll, valid = _per_pixel_stats(pred, target, ignore_label)
    num_valid = jnp.sum(valid.astype(jnp.int32))

    # OHEM threshold: true-class prob of the k-th hardest (lowest-prob) pixel.
    # TODO(synk): top-k / k-th-smallest selection has no clean Pallas TPU
    # equivalent; it runs as lax.top_k in the wrapper (padded pixels carry
    # prob 1.0, so they never displace real candidates).
    threshold = jnp.float32(thresh)
    if min_kept > 0:
        kk = min(n_pixels, min_kept)
        kth = -lax.top_k(-p_true, kk)[0][kk - 1]
        threshold = jnp.maximum(kth, jnp.float32(thresh))

    apply_ohem = jnp.logical_and(num_valid > min_kept, num_valid > 0)
    kept = jnp.where(apply_ohem,
                     jnp.logical_and(valid, p_true <= threshold),
                     valid)

    num_kept = jnp.sum(kept.astype(jnp.float32))
    loss = jnp.sum(jnp.where(kept, nll, 0.0)) / num_kept
    return loss


def ohem_softmax_cross_entropy_loss(preds, target, ignore_label=-1,
                                    thresh=0.6, min_kept=256):
    """Replicates OHEMSoftmaxCrossEntropyLoss.forward (use_weight=False)."""
    loss = None
    for pred in preds:
        l = _base_forward(pred, target, ignore_label=ignore_label,
                          thresh=thresh, min_kept=min_kept)
        loss = l if loss is None else loss + l
    return {"loss": loss}


# ---------------------------------------------------------------------------
# Pure-JAX reference mirroring the PyTorch module (for verification only).
# ---------------------------------------------------------------------------
def _ref_base_forward(pred, target, ignore_label=-1, thresh=0.6, min_kept=256):
    b, c, h, w = pred.shape
    tgt = target.reshape(-1)
    valid = tgt != ignore_label
    tgt0 = jnp.where(valid, tgt, 0).astype(jnp.int32)
    num_valid = int(jnp.sum(valid))

    logp = jax.nn.log_softmax(pred.astype(jnp.float32), axis=1)
    logp = jnp.transpose(logp, (1, 0, 2, 3)).reshape(c, -1)
    prob = jnp.exp(logp)
    idx = jnp.arange(tgt.shape[0])

    kept = valid
    if min_kept < num_valid and num_valid > 0:
        mask_prob = jnp.where(valid, prob[tgt0, idx], 1.0)
        threshold = jnp.float32(thresh)
        if min_kept > 0:
            sorted_mp = jnp.sort(mask_prob)
            kth = sorted_mp[min(mask_prob.shape[0], min_kept) - 1]
            threshold = jnp.where(kth > thresh, kth, jnp.float32(thresh))
        kept = valid & (mask_prob <= threshold)

    nll = -logp[tgt0, idx]
    return jnp.sum(jnp.where(kept, nll, 0.0)) / jnp.sum(kept)


if __name__ == "__main__":
    key = jax.random.PRNGKey(0)
    k1, k2, k3, k4 = jax.random.split(key, 4)

    B, C, H, W = 2, 4, 16, 16
    pred0 = jax.random.normal(k1, (B, C, H, W), dtype=jnp.float32)
    pred1 = jax.random.normal(k2, (B, C, H, W), dtype=jnp.float32)
    labels = jax.random.randint(k3, (B, H, W), 0, C)
    drop = jax.random.bernoulli(k4, 0.1, (B, H, W))
    target = jnp.where(drop, -1, labels).astype(jnp.int32)  # some ignored pixels

    out = ohem_softmax_cross_entropy_loss([pred0, pred1], target,
                                          ignore_label=-1, thresh=0.6,
                                          min_kept=256)
    loss = jax.block_until_ready(out["loss"])

    ref = _ref_base_forward(pred0, target) + _ref_base_forward(pred1, target)
    # Loose-ish tolerance only to be robust against fp tie-breaking exactly at
    # the OHEM threshold; in practice results agree to ~1e-6.
    assert jnp.allclose(loss, ref, rtol=1e-2, atol=1e-3), (loss, ref)

    print("KERNEL_OK")
</pallas_src>

<mosaic_0001>
module attributes {stable_mosaic.version = 11 : i64} {
  func.func @_softmax_stats_kernel(%arg0: i32, %arg1: i32, %arg2: memref<1x4x256xf32, #tpu.memory_space<vmem>>, %arg3: memref<1x1x256xi32, #tpu.memory_space<vmem>>, %arg4: memref<1x1x256xf32, #tpu.memory_space<vmem>>, %arg5: memref<1x1x256xf32, #tpu.memory_space<vmem>>) attributes {dimension_semantics = [#tpu.dimension_semantics<parallel>, #tpu.dimension_semantics<parallel>], iteration_bounds = array<i64: 2, 1>, scalar_prefetch = 0 : i64, scratch_operands = 0 : i64, tpu.core_type = #tpu.core_type<tc>, window_params = [{transform_indices = @transform_0, window_bounds = array<i64: 1, 4, 256>}, {transform_indices = @transform_1, window_bounds = array<i64: 1, 1, 256>}, {transform_indices = @transform_2, window_bounds = array<i64: 1, 1, 256>}, {transform_indices = @transform_3, window_bounds = array<i64: 1, 1, 256>}]} {
    %c0 = arith.constant 0 : index
    %c0_0 = arith.constant 0 : index
    %c0_1 = arith.constant 0 : index
    %0 = vector.load %arg2[%c0, %c0_0, %c0_1] : memref<1x4x256xf32, #tpu.memory_space<vmem>>, vector<1x4x256xf32>
    %1 = vector.shape_cast %0 : vector<1x4x256xf32> to vector<4x256xf32>
    %c0_2 = arith.constant 0 : index
    %c0_3 = arith.constant 0 : index
    %c0_4 = arith.constant 0 : index
    %2 = vector.load %arg3[%c0_2, %c0_3, %c0_4] : memref<1x1x256xi32, #tpu.memory_space<vmem>>, vector<1x1x256xi32>
    %3 = vector.shape_cast %2 : vector<1x1x256xi32> to vector<1x256xi32>
    %c-1_i32 = arith.constant -1 : i32
    %4 = vector.broadcast %c-1_i32 : i32 to vector<1x256xi32>
    %5 = arith.cmpi ne, %3, %4 : vector<1x256xi32>
    %c0_i32 = arith.constant 0 : i32
    %6 = vector.broadcast %c0_i32 : i32 to vector<1x256xi32>
    %7 = arith.select %5, %3, %6 : vector<1x256xi1>, vector<1x256xi32>
    %cst = arith.constant dense<0xFF800000> : vector<256xf32>
    %8 = vector.multi_reduction <maximumf>, %1, %cst [0] : vector<4x256xf32> to vector<256xf32>
    %9 = vector.shape_cast %8 : vector<256xf32> to vector<1x256xf32>
    %10 = vector.broadcast %9 : vector<1x256xf32> to vector<4x256xf32>
    %11 = arith.subf %1, %10 : vector<4x256xf32>
    %12 = math.exp %11 : vector<4x256xf32>
    %cst_5 = arith.constant dense<0.000000e+00> : vector<256xf32>
    %13 = vector.multi_reduction <add>, %12, %cst_5 [0] : vector<4x256xf32> to vector<256xf32>
    %14 = vector.shape_cast %13 : vector<256xf32> to vector<1x256xf32>
    %15 = math.log %14 : vector<1x256xf32>
    %16 = arith.addf %9, %15 : vector<1x256xf32>
    %17 = tpu.iota {dimensions = array<i32: 0>} : vector<4x256xi32>
    %18 = vector.broadcast %7 : vector<1x256xi32> to vector<4x256xi32>
    %19 = arith.cmpi eq, %17, %18 : vector<4x256xi32>
    %cst_6 = arith.constant 0.000000e+00 : f32
    %20 = vector.broadcast %cst_6 : f32 to vector<4x256xf32>
    %21 = arith.select %19, %1, %20 : vector<4x256xi1>, vector<4x256xf32>
    %cst_7 = arith.constant dense<0.000000e+00> : vector<256xf32>
    %22 = vector.multi_reduction <add>, %21, %cst_7 [0] : vector<4x256xf32> to vector<256xf32>
    %23 = vector.shape_cast %22 : vector<256xf32> to vector<1x256xf32>
    %24 = arith.subf %16, %23 : vector<1x256xf32>
    %25 = arith.subf %23, %16 : vector<1x256xf32>
    %26 = math.exp %25 : vector<1x256xf32>
    %cst_8 = arith.constant 1.000000e+00 : f32
    %27 = vector.broadcast %cst_8 : f32 to vector<1x256xf32>
    %28 = arith.select %5, %26, %27 : vector<1x256xi1>, vector<1x256xf32>
    %c0_9 = arith.constant 0 : index
    %c0_10 = arith.constant 0 : index
    %c0_11 = arith.constant 0 : index
    %29 = vector.load %arg4[%c0_9, %c0_10, %c0_11] : memref<1x1x256xf32, #tpu.memory_space<vmem>>, vector<1x1x256xf32>
    %30 = vector.shape_cast %29 : vector<1x1x256xf32> to vector<1x256xf32>
    %31 = vector.shape_cast %28 : vector<1x256xf32> to vector<1x1x256xf32>
    tpu.vector_store %arg4[%c0_9, %c0_10, %c0_11], %31 {strides = array<i32>} : memref<1x1x256xf32, #tpu.memory_space<vmem>>, vector<1x1x256xf32>,
    %cst_12 = arith.constant 0.000000e+00 : f32
    %32 = vector.broadcast %cst_12 : f32 to vector<1x256xf32>
    %33 = arith.select %5, %24, %32 : vector<1x256xi1>, vector<1x256xf32>
    %c0_13 = arith.constant 0 : index
    %c0_14 = arith.constant 0 : index
    %c0_15 = arith.constant 0 : index
    %34 = vector.load %arg5[%c0_13, %c0_14, %c0_15] : memref<1x1x256xf32, #tpu.memory_space<vmem>>, vector<1x1x256xf32>
    %35 = vector.shape_cast %34 : vector<1x1x256xf32> to vector<1x256xf32>
    %36 = vector.shape_cast %33 : vector<1x256xf32> to vector<1x1x256xf32>
    tpu.vector_store %arg5[%c0_13, %c0_14, %c0_15], %36 {strides = array<i32>} : memref<1x1x256xf32, #tpu.memory_space<vmem>>, vector<1x1x256xf32>,
    return
  }
  func.func @transform_0(%arg0: i32, %arg1: i32) -> (i32, i32, i32) {
    %c0_i32 = arith.constant 0 : i32
    %c0_i32_0 = arith.constant 0 : i32
    return %arg0, %c0_i32, %arg1 : i32, i32, i32
  }
  func.func @transform_1(%arg0: i32, %arg1: i32) -> (i32, i32, i32) {
    %c0_i32 = arith.constant 0 : i32
    %c0_i32_0 = arith.constant 0 : i32
    return %arg0, %c0_i32, %arg1 : i32, i32, i32
  }
  func.func @transform_2(%arg0: i32, %arg1: i32) -> (i32, i32, i32) {
    %c0_i32 = arith.constant 0 : i32
    %c0_i32_0 = arith.constant 0 : i32
    return %arg0, %c0_i32, %arg1 : i32, i32, i32
  }
  func.func @transform_3(%arg0: i32, %arg1: i32) -> (i32, i32, i32) {
    %c0_i32 = arith.constant 0 : i32
    %c0_i32_0 = arith.constant 0 : i32
    return %arg0, %c0_i32, %arg1 : i32, i32, i32
  }
}

</mosaic_0001>

<bundles_post_ra>
// kernel: tpu_custom_call.1
= control target key start
LH: loop header
LB: loop body
LE: loop exit
PB: predicated region body
PF: predicated region fallthrough
CT: control target
= control target key end

     0   :  { %9 = vsyncpa [#allocation3], 0  ;;  %s1114_s0 = inlined_call_operand.hbm [shape: f32[2,4,256], index: 0, kind: input, shape index: {}]   ;;  %s1115_s1 = inlined_call_operand.hbm [shape: s32[2,1,256], index: 1, kind: input, shape index: {}]   ;;  %s1116_s2 = inlined_call_operand.hbm [shape: f32[2,1,256], index: 2, kind: output, shape index: {0}]   ;;  %s1117_s3 = inlined_call_operand.hbm [shape: f32[2,1,256], index: 3, kind: output, shape index: {1}]  }
   0x1   :  { %11 = vsyncpa [#allocation3 + $0x1], 0 }
   0x2   :  { %12 = vsyncpa [#allocation6], 0 }
   0x3   :  { %14 = vsyncpa [#allocation6 + $0x1], 0 }
   0x4   :  { %15 = vsyncpa [#allocation4], 0 }
   0x5   :  { %17 = vsyncpa [#allocation4 + $0x1], 0 }
   0x6   :  { %18 = vsyncpa [#allocation9], 0 }
   0x7   :  { %20 = vsyncpa [#allocation9 + $0x1], 0  ;;  %s887_s12 = smov 0   ;;  %s889_s13 = smov 0  }
   0x8   :  { %s891_s14 = smov 0   ;;  %s893_s15 = smov 0  }
   0x9   :  { %s895_s16 = smov 0   ;;  %s897_s17 = smov 0  }
   0xa LB: > { %s579_s18 = sadd.s32 4294967295, %s860_s17   ;;  %s580_s19 = sadd.s32 4294967294, %s860_s17   ;;  %s860_s17 = sphi %s897_s17, %s26_s17   ;;  %s856_s16 = sphi %s895_s16, %s1131_s16   ;;  %s852_s15 = sphi %s893_s15, %s1130_s15   ;;  %s848_s14 = sphi %s891_s14, %s1129_s14   ;;  %s844_s13 = sphi %s889_s13, %s1128_s13   ;;  %s840_s12 = sphi %s887_s12, %s1127_s12  }
   0xb   : > { %s38_s20 = sadd.s32 1, %s856_s16  ;;  %s47_s21 = sadd.s32 1, %s848_s14 }
   0xc   : > { %p40_p0 = scmp.ge.s32.totalorder %s38_s20, 2  ;;  %p54_p1 = scmp.ne.s32.totalorder %s848_s14, %s844_s13 }
   0xd   : > { %p55_p2 = scmp.eq.s32.totalorder %s860_s17, 0  ;;  %p60_p3 = scmp.ne.s32.totalorder %s844_s13, %s840_s12 }
   0xe   : > { %s1133_s20 = smov (%p40_p0, %s38_s20), 0  ;;  %p61_p5 = scmp.eq.s32.totalorder %s579_s18, 0 }
   0xf   : > { %p928_p4 = por %p55_p2, %p54_p1  ;;  %s42_s23 = ssub.s32 %s856_s16, %s1133_s20 }
  0x10   : > { %p114_p6 = scmp.eq.s32.totalorder %s579_s18, 1  ;;  %p45_p7 = scmp.eq.s32.totalorder %s42_s23, 0 }
  0x11   : > { %p934_p8 = por %p61_p5, %p60_p3  ;;  %p120_p10 = scmp.eq.s32.totalorder %s580_s19, 1 }
  0x12   : > { %p938_p9 = por %p114_p6, %p54_p1  ;;  %p628_p13 = scmp.lt.s32.totalorder %s860_s17, 2 }
  0x13   : > { %s943_s26 = scalar_select %p45_p7, %s848_s14, %s47_s21  }
  0x14   : > { %p945_p11 = por %p120_p10, %p60_p3  ;;  %s952_s28 = sand.u32 1, %s848_s14  }
  0x15   : > { %s583_s29 = sshll.u32 %s952_s28, 3  ;;  %s602_s30 = sshll.u32 %s856_s16, 7 }
  0x16   : > { %s180_s6 = scalar_lea.hbm %s1114_s0, %s602_s30  ;;  %s172_s7 = scalar_lea.vmem [#allocation2], %s583_s29 }
  0x17   : > { %s182_s8 = sshll.u32 %s172_s7, 4  ;;  %p961_p0 = pnand %p628_p13, %p928_p4  ;;  %s183_s8 = int_to_ptr.vmem [resolvable:$true] %s182_s8 }
  0x18   : > { %p589_p1 = scmp.ge.s32.totalorder %s860_s17, 1  ;;  %p208_p2 = scmp.lt.s32.totalorder %s860_s17, 3 }
  0x19   : > { %s169_s10 = scalar_lea.sflag [#allocation3], %s952_s28  ;;  %p692_p3 = pneg %p961_p0 }
  0x1a   : > { %s703_s11 = scalar_lea.vmem %s183_s8, 128  ;;  %s862_s18 = smov [#allocation2]  }
  0x1b   : > { %p704_p5 = scmp.ne.s32.totalorder %s183_s8, %s703_s11  ;;  %s708_s19 = sshll.u32 %s862_s18, 4  ;;  %s709_s19 = int_to_ptr.vmem [resolvable:$false] %s708_s19 }
  0x1c   : > { %s710_s21 = scalar_lea.vmem %s709_s19, 256  ;;  %p711_p4 = scmp.lt.s32.totalorder %s183_s8, %s709_s19 }
  0x1d   : > { %p706_p6 = pnand %p704_p5, %p692_p3  ;;  %p712_p10 = scmp.lt.s32.totalorder %s710_s21, %s703_s11 }
  0x1f   : > { %p707_p7 = pneg %p706_p6  ;;  %p713_p13 = por %p712_p10, %p711_p4 }
  0x21   : > { %p714_p12 = pnand %p713_p13, %p707_p7 }
  0x23   : > { %717 = shalt.err (!%p714_p12)
}
  0x24   : > { %617 = dma.hbm_to_vmem [thread:$0]  (!%p961_p0), %s180_s6, 128, %s183_s8, %s169_s10  }
  0x25   : > { %p979_p5 = pnand %p589_p1, %p208_p2  ;;  %s586_s23 = sshll.u32 %s952_s28, 1 }
  0x26   : > { %s603_s29 = sshll.u32 %s856_s16, 5  ;;  %s193_s7 = scalar_lea.vmem [#allocation5], %s586_s23 }
  0x27   : > { %s201_s5 = scalar_lea.hbm %s1115_s1, %s603_s29  ;;  %s203_s11 = sshll.u32 %s193_s7, 4  ;;  %s204_s11 = int_to_ptr.vmem [resolvable:$true] %s203_s11 }
  0x28   : > { %s190_s18 = scalar_lea.sflag [#allocation6], %s952_s28  ;;  %s731_s19 = scalar_lea.vmem %s204_s11, 32 }
  0x29   : > { %p732_p12 = scmp.ne.s32.totalorder %s204_s11, %s731_s19  ;;  %s863_s6 = smov [#allocation5]  }
  0x2a   : > { %s736_s8 = sshll.u32 %s863_s6, 4  ;;  %s737_s8 = int_to_ptr.vmem [resolvable:$false] %s736_s8 }
  0x2b   : > { %p734_p6 = pnand %p732_p12, %p692_p3  ;;  %s738_s10 = scalar_lea.vmem %s737_s8, 64 }
  0x2c   : > { %p739_p1 = scmp.lt.s32.totalorder %s204_s11, %s737_s8  ;;  %p740_p2 = scmp.lt.s32.totalorder %s738_s10, %s731_s19 }
  0x2d   : > { %p735_p7 = pneg %p734_p6 }
  0x2e   : > { %p741_p4 = por %p740_p2, %p739_p1 }
  0x30   : > { %p742_p10 = pnand %p741_p4, %p735_p7 }
  0x32   : > { %745 = shalt.err (!%p742_p10)
}
  0x33   : > { %620 = dma.hbm_to_vmem [thread:$0]  (!%p961_p0), %s201_s5, 32, %s204_s11, %s190_s18  }
  0x34   : > { %212 = sbr.rel (%p979_p5) target bundleno = 175 (0xaf), region = 28  ;;  %s997_s28 = sand.u32 (!%p979_p5), 1, %s844_s13  }
  0x35   : > { %s590_s21 = sshll.u32 (!%p979_p5), %s997_s28, 3  ;;  %s215_s23 = scalar_lea.sflag (!%p979_p5), [#allocation3], %s997_s28 }
  0x36   : > { %s218_s29 = scalar_lea.vmem (!%p979_p5), [#allocation2], %s590_s21 }
  0x39   : > { %823 = dma.done.wait (%p934_p8), %s215_s23, 128  }
  0x3a   : > { %825 = vsyncadd (%p934_p8), %s215_s23, 4294967168  ;;  %s1006_s9 = sshll.u32 %s997_s28, 1  ;;  %s224_s22 = scalar_lea.sflag [#allocation6], %s997_s28 }
  0x3b   : > { %s227_s30 = scalar_lea.vmem [#allocation5], %s1006_s9 }
  0x3c   : > { %827 = dma.done.wait (%p934_p8), %s224_s22, 32  }
  0x3d   : > { %829 = vsyncadd (%p934_p8), %s224_s22, 4294967264  ;;  %vm271_vm0 = vcmask 1043456   ;;  %v264_v0 = vld [vmem:[%s218_s29] sm:$0xff]  ;;  %v316_v18 = vlaneseq  ;;  %v1016_v20 = vld [vmem:[%s227_s30] sm:$0x3]  ;;  %s259_s24 = scalar_lea.vmem [#allocation8], %s1006_s9 }
  0x3e   : > { %v269_v1 = vcombine.high %v264_v0, %v264_v0  ;;  %v272_v2 = vsel %vm271_vm0, %v264_v0, -inf  ;;  %vm266_vm1 = vcmp.ne.s32.totalorder %v1016_v20, 4294967295  ;;  %v864_v57 = vmov 1966171168   ;;  %s434_s4 = sshll.u32 %s259_s24, 4  ;;  %s604_s5 = sshll.u32 %s852_s15, 5  ;;  %s1034_s4 = int_to_ptr.vmem [resolvable:$true] %s434_s4 }
  0x3f   : > { %v273_v3 = vrot.slane %v272_v2, 4  ;;  %v317_v21 = vshrl.u32 %v316_v18, 7  ;;  %v267_v23 = vsel %vm266_vm1, %v1016_v20, 0  ;;  %v356_v58 = vunpack.c.l.s4 %v864_v57  ;;  %s432_s18 = scalar_lea.hbm %s1117_s3, %s604_s5  ;;  %s402_s19 = scalar_lea.sflag [#allocation9], %s997_s28 }
  0x40   : > { %v279_v4 = vsel %vm271_vm0, %v269_v1, -inf  ;;  %vm1030_vm4 = vcmp.lt.s32.totalorder %v316_v18, 256  ;;  %s746_s6 = scalar_lea.vmem %s1034_s4, 32  ;;  %s865_s8 = smov [#allocation8]  }
  0x41   : > { %v274_v5 = vmax.f32 %v272_v2, %v273_v3  ;;  %v280_v6 = vrot.slane %v279_v4, 4  ;;  %v320_v22 = vsub.s32 0, %v317_v21  ;;  %v324_v24 = vsub.s32 1, %v317_v21  ;;  %p747_p8 = scmp.ne.s32.totalorder %s1034_s4, %s746_s6  ;;  %s750_s10 = sshll.u32 %s865_s8, 4  ;;  %s751_s10 = int_to_ptr.vmem [resolvable:$false] %s750_s10 }
  0x42   : > { %v357_v2 = vunpack.c.0.s8 %v356_v58  ;;  %s752_s21 = scalar_lea.vmem %s751_s10, 64  ;;  %p753_p13 = scmp.lt.s32.totalorder %s1034_s4, %s751_s10 }
  0x43   : > { %v275_v7 = vrot.slane %v274_v5, 2  ;;  %v281_v8 = vmax.f32 %v279_v4, %v280_v6  ;;  %v321_v25 = vrot.slane %v267_v23, %v320_v22  ;;  %v325_v26 = vrot.slane %v267_v23, %v324_v24  ;;  %p748_p0 = pnand %p747_p8, %p938_p9  ;;  %p754_p5 = scmp.lt.s32.totalorder %s752_s21, %s746_s6 }
  0x45   : > { %v276_v9 = vmax.f32 %v274_v5, %v275_v7  ;;  %v282_v10 = vrot.slane %v281_v8, 2  ;;  %vm326_vm2 = vcmp.eq.s32.totalorder %v317_v21, %v321_v25  ;;  %vm327_vm3 = vcmp.eq.s32.totalorder %v317_v21, %v325_v26  ;;  %p749_p3 = pneg %p748_p0  ;;  %p755_p12 = por %p754_p5, %p753_p13 }
  0x46   : > { %v328_v31 = vsel %vm326_vm2, %v264_v0, 0.0  ;;  %v329_v35 = vsel %vm327_vm3, %v269_v1, 0.0 }
  0x47   : > { %v277_v11 = vrot.slane %v276_v9, 1  ;;  %v283_v12 = vmax.f32 %v281_v8, %v282_v10  ;;  %v330_v36 = vsel %vm271_vm0, %v328_v31, 0.0  ;;  %v337_v39 = vsel %vm271_vm0, %v329_v35, 0.0  ;;  %p756_p6 = pnand %p755_p12, %p749_p3 }
  0x48   : > { %v331_v42 = vrot.slane %v330_v36, 4  ;;  %v338_v45 = vrot.slane %v337_v39, 4  ;;  %v360_v8 = vsub.s32 %v357_v2, %v317_v21 }
  0x49   : > { %v278_v13 = vmax.f32 %v276_v9, %v277_v11  ;;  %v284_v14 = vrot.slane %v283_v12, 1 }
  0x4a   : > { %v332_v48 = vadd.f32 %v331_v42, %v330_v36  ;;  %v339_v50 = vadd.f32 %v338_v45, %v337_v39 }
  0x4b   : > { %v285_v15 = vmax.f32 %v283_v12, %v284_v14 }
  0x4c   : > { %v333_v51 = vrot.slane %v332_v48, 2  ;;  %v340_v52 = vrot.slane %v339_v50, 2 }
  0x4d   : > { %v288_v16 = vcombine.low %v278_v13, %v285_v15 }
  0x4e   : > { %v334_v53 = vadd.f32 %v333_v51, %v332_v48  ;;  %v341_v54 = vadd.f32 %v340_v52, %v339_v50 }
  0x4f   : > { %v290_v17 = vsub.f32 %v264_v0, %v288_v16 }
  0x50   : > { %v335_v55 = vrot.slane %v334_v53, 1  ;;  %v342_v56 = vrot.slane %v341_v54, 1 }
  0x51   : > { %v291_v19 = vmul.f32 1.442695, %v290_v17 }
  0x52   : > { %v336_v61 = vadd.f32 %v335_v55, %v334_v53  ;;  %v343_v1 = vadd.f32 %v342_v56, %v341_v54 }
  0x53   : > { %680 = vpow2.f32 %v291_v19 }
  0x60   : > { %v681_v27 = vpop.eup %680 }
  0x61   : > { %v294_v28 = vcombine.high %v681_v27, %v681_v27  ;;  %v296_v29 = vsel %vm271_vm0, %v681_v27, 0.0 }
  0x62   : > { %v297_v30 = vrot.slane %v296_v29, 4 }
  0x63   : > { %v303_v32 = vsel %vm271_vm0, %v294_v28, 0.0 }
  0x64   : > { %v298_v33 = vadd.f32 %v297_v30, %v296_v29  ;;  %v304_v34 = vrot.slane %v303_v32, 4 }
  0x66   : > { %v299_v37 = vrot.slane %v298_v33, 2  ;;  %v305_v38 = vadd.f32 %v304_v34, %v303_v32 }
  0x68   : > { %v300_v40 = vadd.f32 %v299_v37, %v298_v33  ;;  %v306_v41 = vrot.slane %v305_v38, 2 }
  0x6a   : > { %v301_v43 = vrot.slane %v300_v40, 1  ;;  %v307_v44 = vadd.f32 %v306_v41, %v305_v38 }
  0x6c   : > { %v302_v46 = vadd.f32 %v301_v43, %v300_v40  ;;  %v308_v47 = vrot.slane %v307_v44, 1 }
  0x6e   : > { %v309_v49 = vadd.f32 %v308_v47, %v307_v44  ;;  %682 = vlog2.f32 %v302_v46 }
  0x70   : > { %684 = vlog2.f32 %v309_v49 }
  0x7b   : > { %v683_v59 = vpop.eup %682 }
  0x7c   : > { %v311_v60 = vmul.f32 0.6931472, %v683_v59 }
  0x7d   : > { %v685_v62 = vpop.eup %684 }
  0x7e   : > { %v313_v63 = vmul.f32 0.6931472, %v685_v62  ;;  %v314_v0 = vadd.f32 %v311_v60, %v278_v13 }
  0x80   : > { %v315_v3 = vadd.f32 %v313_v63, %v285_v15  ;;  %v346_v4 = vsub.f32 %v336_v61, %v314_v0  ;;  %v344_v5 = vsub.f32 %v314_v0, %v336_v61 }
  0x82   : > { %v347_v6 = vsub.f32 %v343_v1, %v315_v3  ;;  %v348_v7 = vmul.f32 1.442695, %v346_v4  ;;  %v345_v9 = vsub.f32 %v315_v3, %v343_v1 }
  0x84   : > { %686 = vpow2.f32 %v348_v7  ;;  %v350_v10 = vmul.f32 1.442695, %v347_v6  ;;  %v378_v11 = vcombine.low %v344_v5, %v345_v9 }
  0x86   : > { %688 = vpow2.f32 %v350_v10  ;;  %v385_v12 = vrot.slane %v378_v11, %v360_v8 }
  0x88   : > { %v392_v14 = vrot.slane %v385_v12, %v360_v8 }
  0x8a   : > { %v394_v15 = vsel %vm266_vm1, %v392_v14, 0.0 }
  0x8b   : > { %395 = vst.msk [vmem:[%s259_s24] sm:$0x3] %vm1030_vm4, %v394_v15 }
  0x8c   : > { %759 = shalt.err (!%p756_p6)
}
  0x8d   : > { %s760_s23 = scalar_lea.hbm %s432_s18, 32  ;;  %s764_s30 = scalar_lea.hbm %s1117_s3, 64 }
  0x8e   : > { %p761_p7 = scmp.ne.s32.totalorder %s432_s18, %s760_s23  ;;  %p765_p4 = scmp.lt.s32.totalorder %s432_s18, %s1117_s3 }
  0x8f   : > { %p766_p10 = scmp.lt.s32.totalorder %s764_s30, %s760_s23 }
  0x90   : > { %p762_p1 = pnand %p761_p7, %p938_p9 }
  0x91   : > { %p767_p8 = por %p766_p10, %p765_p4 }
  0x92   : > { %p763_p2 = pneg %p762_p1 }
  0x94   : > { %p768_p0 = pnand %p767_p8, %p763_p2 }
  0x96   : > { %771 = shalt.err (!%p768_p0)
}
  0x97   : > { %611 = dma.vmem_to_hbm [thread:$0]  (%p938_p9), %s1034_s4, 32, %s432_s18, %s402_s19   ;;  %v687_v16 = vpop.eup %686 }
  0x98   : > { %v689_v17 = vpop.eup %688  ;;  %s252_s11 = scalar_lea.vmem [#allocation7], %s1006_s9  ;;  %s416_s21 = scalar_lea.hbm %s1116_s2, %s604_s5 }
  0x99   : > { %v354_v18 = vcombine.low %v687_v16, %v689_v17  ;;  %s418_s6 = sshll.u32 %s252_s11, 4  ;;  %s397_s9 = scalar_lea.sflag [#allocation4], %s997_s28  ;;  %s1063_s6 = int_to_ptr.vmem [resolvable:$true] %s418_s6 }
  0x9a   : > { %s772_s4 = scalar_lea.vmem %s1063_s6, 32  ;;  %s866_s15 = smov [#allocation7]  }
  0x9b   : > { %v361_v19 = vrot.slane %v354_v18, %v360_v8  ;;  %p773_p3 = scmp.ne.s32.totalorder %s1063_s6, %s772_s4  ;;  %s776_s18 = sshll.u32 %s866_s15, 4  ;;  %s777_s18 = int_to_ptr.vmem [resolvable:$false] %s776_s18 }
  0x9c   : > { %s778_s19 = scalar_lea.vmem %s777_s18, 64  ;;  %p779_p12 = scmp.lt.s32.totalorder %s1063_s6, %s777_s18 }
  0x9d   : > { %v368_v21 = vrot.slane %v361_v19, %v360_v8  ;;  %p774_p13 = pnand %p773_p3, %p938_p9  ;;  %p780_p6 = scmp.lt.s32.totalorder %s778_s19, %s772_s4 }
  0x9f   : > { %v370_v22 = vsel %vm266_vm1, %v368_v21, 1.0  ;;  %p775_p5 = pneg %p774_p13  ;;  %p781_p7 = por %p780_p6, %p779_p12 }
  0xa0   : > { %375 = vst.msk [vmem:[%s252_s11] sm:$0x3] %vm1030_vm4, %v370_v22 }
  0xa1   : > { %p782_p1 = pnand %p781_p7, %p775_p5 }
  0xa3   : > { %785 = shalt.err (!%p782_p1)
}
  0xa4   : > { %s786_s5 = scalar_lea.hbm %s416_s21, 32  ;;  %s790_s29 = scalar_lea.hbm %s1116_s2, 64 }
  0xa5   : > { %p787_p2 = scmp.ne.s32.totalorder %s416_s21, %s786_s5  ;;  %p791_p8 = scmp.lt.s32.totalorder %s416_s21, %s1116_s2 }
  0xa6   : > { %p792_p0 = scmp.lt.s32.totalorder %s790_s29, %s786_s5 }
  0xa7   : > { %p788_p4 = pnand %p787_p2, %p938_p9 }
  0xa8   : > { %p793_p3 = por %p792_p0, %p791_p8 }
  0xa9   : > { %p789_p10 = pneg %p788_p4 }
  0xab   : > { %p794_p13 = pnand %p793_p3, %p789_p10 }
  0xad   : > { %797 = shalt.err (!%p794_p13)
}
  0xae   : > { %610 = dma.vmem_to_hbm [thread:$0]  (%p938_p9), %s1063_s6, 32, %s416_s21, %s397_s9  }
  0xaf PF: > { %s446_s24 = sand.u32 1, %s840_s12   ;;  %p1126_p5 = scmp.ge.s32.totalorder %s860_s17, 2 }
  0xb0   : > { %s447_s7 = scalar_lea.sflag [#allocation4], %s446_s24 }
  0xb1   : > { %p622_p12 = pnand %p1126_p5, %p945_p11 }
  0xb3   : > { %p623_p6 = pneg %p622_p12 }
  0xb5   : > { %831 = dma.done.wait (%p623_p6), %s447_s7, 32  }
  0xb6   : > { %833 = vsyncadd (%p623_p6), %s447_s7, 4294967264  ;;  %s456_s11 = scalar_lea.sflag [#allocation9], %s446_s24 }
  0xb7   : > { %835 = dma.done.wait (%p623_p6), %s456_s11, 32  }
  0xb8   : > { %837 = vsyncadd (%p623_p6), %s456_s11, 4294967264  ;;  %s26_s17 = sadd.s32 1, %s860_s17   ;;  %s1127_s12 = smov %s844_s13 }
  0xb9   : > { %p23_p7 = scmp.ge.s32.totalorder %s26_s17, 4   ;;  %s1128_s13 = smov %s848_s14 }
  0xba   : > { %s1129_s14 = smov %s943_s26  ;;  %s1130_s15 = smov %s856_s16 }
  0xbb   : > { %s1131_s16 = smov %s1133_s20  ;;  %25 = sbr.rel (!%p23_p7) target bundleno = 10 (0xa), region = 103 }
  0xc0   :  { %461 = vsyncpa [#allocation3], 1 }
  0xc1   :  { %463 = vsyncpa [#allocation3 + $0x1], 1 }
  0xc2   :  { %464 = vsyncpa [#allocation6], 1 }
  0xc3   :  { %466 = vsyncpa [#allocation6 + $0x1], 1 }
  0xc4   :  { %467 = vsyncpa [#allocation4], 1 }
  0xc5   :  { %469 = vsyncpa [#allocation4 + $0x1], 1 }
  0xc6   :  { %470 = vsyncpa [#allocation9], 1 }
  0xc7   :  { %472 = vsyncpa [#allocation9 + $0x1], 1 }

</bundles_post_ra>
